<compile_context>
chip_gen: v7x
topology: tpu7x:2x2x1
jax: 0.10.0
libtpu: 0.0.40
codegen_flags: <defaults>
</compile_context>

<pallas_src>
import functools
import math

import jax
import jax.numpy as jnp
from jax.experimental import pallas as pl
from jax.experimental.pallas import tpu as pltpu

BN_EPS = 1e-5
GINE_EPS = 0.0
NEG_INF = -1e30
LANE = 128


def _round_up(v, m):
    return ((v + m - 1) // m) * m


def _bn_eval(x, gamma, beta):
    # BatchNorm1d, eval mode, running_mean=0 / running_var=1 (reference helper).
    return x * (gamma * (1.0 / math.sqrt(1.0 + BN_EPS))) + beta


def _vmem_limit_bytes():
    # per-generation scoped-VMEM budget (~48 MiB on v7x, ~96 MiB on v5e/v6e)
    try:
        cap = int(pltpu.get_tpu_info().vmem_capacity_bytes)
        return min((cap * 3) // 4, 100 * 1024 * 1024)
    except Exception:  # noqa: BLE001 - fall back to a safe default
        return 32 * 1024 * 1024


# --------------------------------------------------------------------------- K1
def _project_kernel(x_ref, w1_ref, b1_ref, wq_ref, bq_ref, wk_ref, bk_ref,
                    wv_ref, bv_ref, xo_ref, qo_ref, ko_ref, vo_ref):
    f32, bf16 = jnp.float32, jnp.bfloat16
    xb = x_ref[...].astype(bf16)
    xp = jnp.dot(xb, w1_ref[...], preferred_element_type=f32) + b1_ref[...]
    xo_ref[...] = xp
    xpb = xp.astype(bf16)
    qo_ref[...] = (jnp.dot(xpb, wq_ref[...], preferred_element_type=f32)
                   + bq_ref[...]).astype(qo_ref.dtype)
    ko_ref[...] = (jnp.dot(xpb, wk_ref[...], preferred_element_type=f32)
                   + bk_ref[...]).astype(ko_ref.dtype)
    vo_ref[...] = (jnp.dot(xpb, wv_ref[...], preferred_element_type=f32)
                   + bv_ref[...]).astype(vo_ref.dtype)


# --------------------------------------------------------------------------- K2
def _edge_message_kernel(xj_ref, ea_ref, we_ref, be_ref, msg_ref):
    f32, bf16 = jnp.float32, jnp.bfloat16
    e = jnp.dot(ea_ref[...].astype(bf16), we_ref[...],
                preferred_element_type=f32) + be_ref[...]
    msg_ref[...] = jnp.maximum(xj_ref[...].astype(f32) + e, 0.0).astype(msg_ref.dtype)


# --------------------------------------------------------------------------- K2b
def _aggregate_kernel(dmin_ref, dmax_ref, dst_ref, msg_ref, aggr_ref):
    f32, bf16 = jnp.float32, jnp.bfloat16
    i, e = pl.program_id(0), pl.program_id(1)
    tn = aggr_ref.shape[0]
    lo = i * tn

    @pl.when(e == 0)
    def _init():
        aggr_ref[...] = jnp.zeros_like(aggr_ref)

    # dst-sorted edges: only edge tiles whose dst range intersects this node tile matter.
    @pl.when(jnp.logical_and(dmin_ref[e] <= lo + tn - 1, dmax_ref[e] >= lo))
    def _scatter():
        te = dst_ref.shape[1]
        rows = jax.lax.broadcasted_iota(jnp.int32, (tn, te), 0) + lo
        scat = (rows == dst_ref[...]).astype(bf16)                  # [TN, TE] one-hot
        # padded edges carry dst = -1 and therefore never match any row (never scattered)
        aggr_ref[...] += jnp.dot(scat, msg_ref[...], preferred_element_type=f32)


# --------------------------------------------------------------------------- K3
def _gps_kernel(qmin_ref, qmax_ref, kmin_ref, kmax_ref,
                q_ref, k_ref, v_ref, x_ref, aggr_ref, bq_ref, bk_ref,
                wn1_ref, bn1_ref, wn2_ref, bn2_ref, g1_ref, bt1_ref,
                wo_ref, bo_ref, g2_ref, bt2_ref,
                wm1_ref, bm1_ref, wm2_ref, bm2_ref, g3_ref, bt3_ref,
                out_ref, m_scr, l_scr, acc_scr, *, heads, dh):
    f32, bf16 = jnp.float32, jnp.bfloat16
    i, j = pl.program_id(0), pl.program_id(1)
    tn = q_ref.shape[0]

    @pl.when(j == 0)
    def _init():
        m_scr[...] = jnp.full(m_scr.shape, -jnp.inf, f32)
        l_scr[...] = jnp.zeros(l_scr.shape, f32)
        acc_scr[...] = jnp.zeros(acc_scr.shape, f32)

    # skip kv tiles whose graph-id range cannot overlap this node tile's range
    overlap = jnp.logical_and(qmin_ref[i] <= kmax_ref[j], kmin_ref[j] <= qmax_ref[i])

    @pl.when(overlap)
    def _flash_step():
        q = q_ref[...]                                  # [TN, Cp] bf16 (scale folded in)
        k = k_ref[...]                                  # [TK, Cp] bf16
        v = v_ref[...]                                  # [TK, Cp] bf16
        mask = bq_ref[...] == bk_ref[...]               # [TN, TK] same-graph mask
        bias = jnp.where(mask, 0.0, NEG_INF).astype(f32)
        m_all, l_all = m_scr[...], l_scr[...]           # [TN, H]
        m_parts, l_parts, a_parts, pv_parts = [], [], [], []
        for h in range(heads):                          # static head loop, lane-dense data
            sl = slice(h * dh, (h + 1) * dh)
            s = jax.lax.dot_general(q[:, sl], k[:, sl], (((1,), (1,)), ((), ())),
                                    preferred_element_type=f32) + bias
            m_prev = m_all[:, h:h + 1]
            m_new = jnp.maximum(m_prev, jnp.max(s, axis=-1, keepdims=True))
            alpha = jnp.exp(m_prev - m_new)
            # explicit zeroing: fully-masked rows never acquire garbage mass
            p = jnp.where(mask, jnp.exp(s - m_new), 0.0)
            l_parts.append(alpha * l_all[:, h:h + 1] + jnp.sum(p, axis=-1, keepdims=True))
            pv_parts.append(jnp.dot(p.astype(bf16), v[:, sl],
                                    preferred_element_type=f32))
            a_parts.append(jnp.broadcast_to(alpha, (tn, dh)))
            m_parts.append(m_new)
        m_scr[...] = jnp.concatenate(m_parts, axis=-1)
        l_scr[...] = jnp.concatenate(l_parts, axis=-1)
        pad_w = acc_scr.shape[1] - heads * dh
        zpad = [jnp.zeros((tn, pad_w), f32)] if pad_w else []
        pv = jnp.concatenate(pv_parts + zpad, axis=-1)          # lane-dense [TN, Cp]
        alpha_full = jnp.concatenate(a_parts + zpad, axis=-1)
        acc_scr[...] = alpha_full * acc_scr[...] + pv

    @pl.when(j == pl.num_programs(1) - 1)
    def _finalize():
        x = x_ref[...]                                  # [TN, Cp] f32 residual
        l_all = l_scr[...]
        acc = acc_scr[...]
        # exact per-head normalization (once per node tile)
        o_parts = [acc[:, h * dh:(h + 1) * dh] / l_all[:, h:h + 1]
                   for h in range(heads)]
        o = jnp.concatenate(o_parts, axis=-1)           # [TN, H*dh] lane-dense
        pad = wo_ref.shape[0] - o.shape[1]
        if pad:
            o = jnp.concatenate([o, jnp.zeros((tn, pad), f32)], axis=-1)
        # single out-projection matmul (head concat folded into wo)
        attn = jnp.dot(o.astype(bf16), wo_ref[...],
                       preferred_element_type=f32) + bo_ref[...]
        h_attn = (attn + x) * g2_ref[...] + bt2_ref[...]          # residual + BN(eval)

        # local GINE-style MPNN (aggr precomputed by the scatter kernel)
        h_loc = (1.0 + GINE_EPS) * x + aggr_ref[...]
        h_loc = jnp.maximum(jnp.dot(h_loc.astype(bf16), wn1_ref[...],
                                    preferred_element_type=f32) + bn1_ref[...], 0.0)
        h_loc = jnp.dot(h_loc.astype(bf16), wn2_ref[...],
                        preferred_element_type=f32) + bn2_ref[...]
        h_local = (h_loc + x) * g1_ref[...] + bt1_ref[...]        # residual + BN(eval)

        # combine + FFN (C -> 2C -> C), residual + BN(eval)
        out = h_local + h_attn
        mlp = jnp.maximum(jnp.dot(out.astype(bf16), wm1_ref[...],
                                  preferred_element_type=f32) + bm1_ref[...], 0.0)
        mlp = jnp.dot(mlp.astype(bf16), wm2_ref[...],
                      preferred_element_type=f32) + bm2_ref[...]
        out_ref[...] = ((out + mlp) * g3_ref[...] + bt3_ref[...]).astype(out_ref.dtype)


# --------------------------------------------------------------------------- wrapper
def gps_conv_block(x, edge_index, edge_attr, batch_index, params, *, heads,
                   tile_n=256, tile_kv=512, tile_e=512):
    N, in_c = x.shape
    E = edge_index.shape[1]
    ed = edge_attr.shape[1]
    C = params["w1"].shape[1]
    assert C % heads == 0
    dh = C // heads
    assert tile_n % 8 == 0 and tile_kv % 128 == 0 and tile_e % 128 == 0
    assert max(tile_n, tile_kv) % min(tile_n, tile_kv) == 0

    f32, bf16, i32 = jnp.float32, jnp.bfloat16, jnp.int32
    c_pad = _round_up(C, LANE)
    c_r = _round_up(C, 8)                       # out-projection contraction rows
    h2_pad = _round_up(2 * C, LANE)
    in_pad = _round_up(in_c, 8)
    ed_pad = _round_up(ed, 8)
    n_pad = _round_up(N, max(tile_n, tile_kv))
    e_pad = _round_up(E, tile_e)
    n_tiles, kv_tiles, e_tiles = n_pad // tile_n, n_pad // tile_kv, e_pad // tile_e
    vmem_limit = _vmem_limit_bytes()
    inv_std = 1.0 / math.sqrt(1.0 + BN_EPS)
    scale = 1.0 / math.sqrt(dh)

    def pad2(a, r, c_, dtype=f32):
        return jnp.pad(a, ((0, r - a.shape[0]), (0, c_ - a.shape[1]))).astype(dtype)

    # ---- weight prep: pad to lane-dense shapes, bf16 cast, fold scale & BN inv_std ----
    w1 = pad2(params["w1"], in_pad, c_pad, bf16); b1 = pad2(params["b1"], 1, c_pad)
    wq = pad2(params["wq"] * scale, c_pad, c_pad, bf16)        # 1/sqrt(dh) folded into Q
    bqw = pad2(params["bq"] * scale, 1, c_pad)
    wk = pad2(params["wk"], c_pad, c_pad, bf16); bkw = pad2(params["bk"], 1, c_pad)
    wv = pad2(params["wv"], c_pad, c_pad, bf16); bvw = pad2(params["bv"], 1, c_pad)
    we = pad2(params["we"], ed_pad, c_pad, bf16); be = pad2(params["be"], 1, c_pad)
    wn1 = pad2(params["wn1"], c_pad, c_pad, bf16); bn1 = pad2(params["bn1"], 1, c_pad)
    wn2 = pad2(params["wn2"], c_pad, c_pad, bf16); bn2 = pad2(params["bn2"], 1, c_pad)
    wo = pad2(params["wo"], c_r, c_pad, bf16); bo = pad2(params["bo"], 1, c_pad)
    wm1 = pad2(params["wm1"], c_pad, h2_pad, bf16); bm1 = pad2(params["bm1"], 1, h2_pad)
    wm2 = pad2(params["wm2"], h2_pad, c_pad, bf16); bm2 = pad2(params["bm2"], 1, c_pad)
    g1 = pad2(params["g1"] * inv_std, 1, c_pad); bt1 = pad2(params["bt1"], 1, c_pad)
    g2 = pad2(params["g2"] * inv_std, 1, c_pad); bt2 = pad2(params["bt2"], 1, c_pad)
    g3 = pad2(params["g3"] * inv_std, 1, c_pad); bt3 = pad2(params["bt3"], 1, c_pad)

    xin = pad2(x, n_pad, in_pad)

    def full_spec(arr):
        nd = arr.ndim
        return pl.BlockSpec(arr.shape, lambda *_: (0,) * nd)

    # ---- K1: Linear(in->C) plus Q/K/V projections (bf16), tiled over node rows ----
    x_proj, q_all, k_all, v_all = pl.pallas_call(
        _project_kernel,
        out_shape=(jax.ShapeDtypeStruct((n_pad, c_pad), f32),
                   jax.ShapeDtypeStruct((n_pad, c_pad), bf16),
                   jax.ShapeDtypeStruct((n_pad, c_pad), bf16),
                   jax.ShapeDtypeStruct((n_pad, c_pad), bf16)),
        grid=(n_pad // tile_n,),
        in_specs=[pl.BlockSpec((tile_n, in_pad), lambda i: (i, 0)),
                  full_spec(w1), full_spec(b1), full_spec(wq), full_spec(bqw),
                  full_spec(wk), full_spec(bkw), full_spec(wv), full_spec(bvw)],
        out_specs=(pl.BlockSpec((tile_n, c_pad), lambda i: (i, 0)),) * 4,
        compiler_params=pltpu.CompilerParams(
            dimension_semantics=("parallel",), vmem_limit_bytes=vmem_limit),
    )(xin, w1, b1, wq, bqw, wk, bkw, wv, bvw)

    # ---- edge bookkeeping (XLA, not heavy math): destination-sort + source pre-gather ----
    src_idx = edge_index[0].astype(i32)
    dst_idx = edge_index[1].astype(i32)
    order = jnp.argsort(dst_idx)
    src_s, dst_s, ea_s = src_idx[order], dst_idx[order], edge_attr[order]

    eattr = pad2(ea_s, e_pad, ed_pad)
    src_pad = jnp.zeros((e_pad,), i32).at[:E].set(src_s)
    xj = jnp.take(x_proj, src_pad, axis=0).astype(bf16)         # pre-gathered x_proj[src]
    dst_row = jnp.full((1, e_pad), -1, i32).at[0, :E].set(dst_s)
    dst_flat = jnp.full((e_pad,), -1, i32).at[:E].set(dst_s)
    dmin = dst_flat.reshape(e_tiles, tile_e).min(axis=1)
    dmax = dst_flat.reshape(e_tiles, tile_e).max(axis=1)

    # ---- K2: edge messages relu(x[src] + Lin(edge_attr)), tiled over edge rows ----
    msg = pl.pallas_call(
        _edge_message_kernel,
        out_shape=jax.ShapeDtypeStruct((e_pad, c_pad), bf16),
        grid=(e_pad // tile_e,),
        in_specs=[pl.BlockSpec((tile_e, c_pad), lambda e: (e, 0)),
                  pl.BlockSpec((tile_e, ed_pad), lambda e: (e, 0)),
                  full_spec(we), full_spec(be)],
        out_specs=pl.BlockSpec((tile_e, c_pad), lambda e: (e, 0)),
        compiler_params=pltpu.CompilerParams(
            dimension_semantics=("parallel",), vmem_limit_bytes=vmem_limit),
    )(xj, eattr, we, be)

    # ---- K2b: scatter-add of dst-sorted messages into node tiles (skip far tiles) ----
    aggr = pl.pallas_call(
        _aggregate_kernel,
        out_shape=jax.ShapeDtypeStruct((n_pad, c_pad), f32),
        grid_spec=pltpu.PrefetchScalarGridSpec(
            num_scalar_prefetch=2,
            grid=(n_pad // tile_n, e_tiles),
            in_specs=[pl.BlockSpec((1, tile_e), lambda i, e, *_: (0, e)),
                      pl.BlockSpec((tile_e, c_pad), lambda i, e, *_: (e, 0))],
            out_specs=pl.BlockSpec((tile_n, c_pad), lambda i, e, *_: (i, 0))),
        compiler_params=pltpu.CompilerParams(
            dimension_semantics=("parallel", "arbitrary"),
            vmem_limit_bytes=vmem_limit),
    )(dmin, dmax, dst_row, msg)

    # ---- batch-id vectors + per-tile ranges (skipping is conservative: correct even if
    #      batch_index is not graph-sorted; it only skips provably-disjoint tile pairs) ----
    bq_pad = jnp.full((n_pad,), -1, i32).at[:N].set(batch_index.astype(i32))
    bq_col = bq_pad.reshape(n_pad, 1)
    bk_row = bq_pad.reshape(1, n_pad)
    qtmin = bq_pad.reshape(n_tiles, tile_n).min(axis=1)
    qtmax = bq_pad.reshape(n_tiles, tile_n).max(axis=1)
    ktmin = bq_pad.reshape(kv_tiles, tile_kv).min(axis=1)
    ktmax = bq_pad.reshape(kv_tiles, tile_kv).max(axis=1)

    # ---- K3: GPSConv (masked flash MHA + combine with local branch + FFN) ----
    weights = [wn1, bn1, wn2, bn2, g1, bt1, wo, bo, g2, bt2,
               wm1, bm1, wm2, bm2, g3, bt3]
    out = pl.pallas_call(
        functools.partial(_gps_kernel, heads=heads, dh=dh),
        out_shape=jax.ShapeDtypeStruct((n_pad, c_pad), f32),
        grid_spec=pltpu.PrefetchScalarGridSpec(
            num_scalar_prefetch=4,
            grid=(n_tiles, kv_tiles),
            in_specs=[pl.BlockSpec((tile_n, c_pad), lambda i, j, *_: (i, 0)),   # Q
                      pl.BlockSpec((tile_kv, c_pad), lambda i, j, *_: (j, 0)),  # K
                      pl.BlockSpec((tile_kv, c_pad), lambda i, j, *_: (j, 0)),  # V
                      pl.BlockSpec((tile_n, c_pad), lambda i, j, *_: (i, 0)),   # x residual
                      pl.BlockSpec((tile_n, c_pad), lambda i, j, *_: (i, 0)),   # aggr
                      pl.BlockSpec((tile_n, 1), lambda i, j, *_: (i, 0)),       # batch (rows)
                      pl.BlockSpec((1, tile_kv), lambda i, j, *_: (0, j)),      # batch (cols)
                      ] + [full_spec(w) for w in weights],
            out_specs=pl.BlockSpec((tile_n, c_pad), lambda i, j, *_: (i, 0)),
            scratch_shapes=[pltpu.VMEM((tile_n, heads), f32),      # running max (per head)
                            pltpu.VMEM((tile_n, heads), f32),      # running sum (per head)
                            pltpu.VMEM((tile_n, c_pad), f32)]),    # lane-dense accumulator
        compiler_params=pltpu.CompilerParams(
            dimension_semantics=("parallel", "arbitrary"),
            vmem_limit_bytes=vmem_limit),
    )(qtmin, qtmax, ktmin, ktmax, q_all, k_all, v_all, x_proj, aggr,
      bq_col, bk_row, *weights)

    return out[:N, :C]


# --------------------------------------------------------------------------- reference
def ref_forward(x, edge_index, edge_attr, batch_index, p, *, heads):
    """Pure-JAX f32 reference of the module forward."""
    N = x.shape[0]
    x = x @ p["w1"] + p["b1"]
    C = x.shape[-1]
    Dh = C // heads
    e = edge_attr @ p["we"] + p["be"]
    msg = jnp.maximum(x[edge_index[0]] + e, 0.0)
    aggr = jax.ops.segment_sum(msg, edge_index[1], num_segments=N)
    h = (1.0 + GINE_EPS) * x + aggr
    h = jnp.maximum(h @ p["wn1"] + p["bn1"], 0.0) @ p["wn2"] + p["bn2"]
    h_local = _bn_eval(h + x, p["g1"], p["bt1"])
    q, k, v = x @ p["wq"] + p["bq"], x @ p["wk"] + p["bk"], x @ p["wv"] + p["bv"]
    mask = batch_index[:, None] == batch_index[None, :]
    outs = []
    for hh in range(heads):
        qh, kh, vh = (t[:, hh * Dh:(hh + 1) * Dh] for t in (q, k, v))
        s = (qh @ kh.T) / math.sqrt(Dh)
        s = jnp.where(mask, s, NEG_INF)
        s = s - jnp.max(s, axis=-1, keepdims=True)
        w = jnp.exp(s)
        w = w / jnp.sum(w, axis=-1, keepdims=True)
        outs.append(w @ vh)
    attn = jnp.concatenate(outs, axis=-1) @ p["wo"] + p["bo"]
    h_attn = _bn_eval(attn + x, p["g2"], p["bt2"])
    out = h_local + h_attn
    m = jnp.maximum(out @ p["wm1"] + p["bm1"], 0.0) @ p["wm2"] + p["bm2"]
    return _bn_eval(out + m, p["g3"], p["bt3"])


def init_params(key, in_c, c, edge_dim):
    ks = iter(jax.random.split(key, 32))

    def w(shape):
        return 0.1 * jax.random.normal(next(ks), shape, dtype=jnp.float32)

    return {
        "w1": w((in_c, c)), "b1": w((1, c)),
        "we": w((edge_dim, c)), "be": w((1, c)),
        "wn1": w((c, c)), "bn1": w((1, c)),
        "wn2": w((c, c)), "bn2": w((1, c)),
        "g1": jnp.ones((1, c), jnp.float32), "bt1": jnp.zeros((1, c), jnp.float32),
        "wq": w((c, c)), "bq": w((1, c)),
        "wk": w((c, c)), "bk": w((1, c)),
        "wv": w((c, c)), "bv": w((1, c)),
        "wo": w((c, c)), "bo": w((1, c)),
        "g2": jnp.ones((1, c), jnp.float32), "bt2": jnp.zeros((1, c), jnp.float32),
        "wm1": w((c, 2 * c)), "bm1": w((1, 2 * c)),
        "wm2": w((2 * c, c)), "bm2": w((1, c)),
        "g3": jnp.ones((1, c), jnp.float32), "bt3": jnp.zeros((1, c), jnp.float32),
    }


if __name__ == "__main__":
    key = jax.random.PRNGKey(0)
    k_x, k_e, k_p = jax.random.split(key, 3)

    # 4 graphs of 64 nodes + 1 graph of 20 nodes -> N=276 (pads to 384 with 128 tiles):
    # exercises multi-tile node/kv grids, padded rows/edges, cross-graph kv-tile skipping
    # in K3 and edge-bucket skipping in K2b.
    SIZES = [64, 64, 64, 64, 20]
    N = sum(SIZES)
    IN_C, C, HEADS, EDGE_DIM = 16, 32, 4, 1

    x = jax.random.normal(k_x, (N, IN_C), dtype=jnp.float32)

    # bidirectional ring edges within each graph
    src_l, dst_l, batch_l = [], [], []
    base = 0
    for g, sz in enumerate(SIZES):
        for i in range(sz):
            a, b = base + i, base + (i + 1) % sz
            src_l += [a, b]
            dst_l += [b, a]
        batch_l += [g] * sz
        base += sz
    edge_index = jnp.array([src_l, dst_l], dtype=jnp.int32)          # [2, E]
    E = edge_index.shape[1]
    edge_attr = jax.random.normal(k_e, (E, EDGE_DIM), dtype=jnp.float32)
    batch_index = jnp.array(batch_l, dtype=jnp.int32)

    params = init_params(k_p, IN_C, C, EDGE_DIM)

    out = gps_conv_block(x, edge_index, edge_attr, batch_index, params,
                         heads=HEADS, tile_n=128, tile_kv=128, tile_e=128)
    out = jax.block_until_ready(out)

    ref = ref_forward(x, edge_index, edge_attr, batch_index, params, heads=HEADS)
    assert out.shape == (N, C)
    # bf16 MXU operands in the kernel vs pure-f32 reference (normalization is exact)
    assert jnp.allclose(out, ref, atol=5e-2, rtol=5e-2), "kernel/reference mismatch"

    print("KERNEL_OK")
</pallas_src>

<mosaic_0001>
module attributes {stable_mosaic.version = 11 : i64} {
  func.func @_project_kernel(%arg0: i32, %arg1: memref<128x16xf32, #tpu.memory_space<vmem>>, %arg2: memref<16x128xbf16, #tpu.memory_space<vmem>>, %arg3: memref<1x128xf32, #tpu.memory_space<vmem>>, %arg4: memref<128x128xbf16, #tpu.memory_space<vmem>>, %arg5: memref<1x128xf32, #tpu.memory_space<vmem>>, %arg6: memref<128x128xbf16, #tpu.memory_space<vmem>>, %arg7: memref<1x128xf32, #tpu.memory_space<vmem>>, %arg8: memref<128x128xbf16, #tpu.memory_space<vmem>>, %arg9: memref<1x128xf32, #tpu.memory_space<vmem>>, %arg10: memref<128x128xf32, #tpu.memory_space<vmem>>, %arg11: memref<128x128xbf16, #tpu.memory_space<vmem>>, %arg12: memref<128x128xbf16, #tpu.memory_space<vmem>>, %arg13: memref<128x128xbf16, #tpu.memory_space<vmem>>) attributes {dimension_semantics = [#tpu.dimension_semantics<parallel>], iteration_bounds = array<i64: 3>, scalar_prefetch = 0 : i64, scratch_operands = 0 : i64, tpu.core_type = #tpu.core_type<tc>, window_params = [{transform_indices = @transform_0, window_bounds = array<i64: 128, 16>}, {pipeline_mode = #tpu.pipeline_mode<synchronous>, transform_indices = @transform_1, window_bounds = array<i64: 16, 128>}, {pipeline_mode = #tpu.pipeline_mode<synchronous>, transform_indices = @transform_2, window_bounds = array<i64: 1, 128>}, {pipeline_mode = #tpu.pipeline_mode<synchronous>, transform_indices = @transform_3, window_bounds = array<i64: 128, 128>}, {pipeline_mode = #tpu.pipeline_mode<synchronous>, transform_indices = @transform_4, window_bounds = array<i64: 1, 128>}, {pipeline_mode = #tpu.pipeline_mode<synchronous>, transform_indices = @transform_5, window_bounds = array<i64: 128, 128>}, {pipeline_mode = #tpu.pipeline_mode<synchronous>, transform_indices = @transform_6, window_bounds = array<i64: 1, 128>}, {pipeline_mode = #tpu.pipeline_mode<synchronous>, transform_indices = @transform_7, window_bounds = array<i64: 128, 128>}, {pipeline_mode = #tpu.pipeline_mode<synchronous>, transform_indices = @transform_8, window_bounds = array<i64: 1, 128>}, {transform_indices = @transform_9, window_bounds = array<i64: 128, 128>}, {transform_indices = @transform_10, window_bounds = array<i64: 128, 128>}, {transform_indices = @transform_11, window_bounds = array<i64: 128, 128>}, {transform_indices = @transform_12, window_bounds = array<i64: 128, 128>}]} {
    %c0 = arith.constant 0 : index
    %c0_0 = arith.constant 0 : index
    %0 = vector.load %arg1[%c0, %c0_0] : memref<128x16xf32, #tpu.memory_space<vmem>>, vector<128x16xf32>
    %1 = arith.truncf %0 : vector<128x16xf32> to vector<128x16xbf16>
    %c0_1 = arith.constant 0 : index
    %c0_2 = arith.constant 0 : index
    %2 = vector.load %arg2[%c0_1, %c0_2] : memref<16x128xbf16, #tpu.memory_space<vmem>>, vector<16x128xbf16>
    %cst = arith.constant dense<0.000000e+00> : vector<128x128xf32>
    %3 = tpu.matmul %1, %2, %cst {dimension_numbers = #tpu.dot_dimension_numbers<[1], [0], [0], [1], [0, 0, 1, 1], [], []>} : vector<128x16xbf16>, vector<16x128xbf16>, vector<128x128xf32> -> vector<128x128xf32>
    %c0_3 = arith.constant 0 : index
    %c0_4 = arith.constant 0 : index
    %4 = vector.load %arg3[%c0_3, %c0_4] : memref<1x128xf32, #tpu.memory_space<vmem>>, vector<1x128xf32>
    %5 = vector.broadcast %4 : vector<1x128xf32> to vector<128x128xf32>
    %6 = arith.addf %3, %5 : vector<128x128xf32>
    %c0_5 = arith.constant 0 : index
    %c0_6 = arith.constant 0 : index
    %7 = vector.load %arg10[%c0_5, %c0_6] : memref<128x128xf32, #tpu.memory_space<vmem>>, vector<128x128xf32>
    tpu.vector_store %arg10[%c0_5, %c0_6], %6 {strides = array<i32>} : memref<128x128xf32, #tpu.memory_space<vmem>>, vector<128x128xf32>,
    %8 = arith.truncf %6 : vector<128x128xf32> to vector<128x128xbf16>
    %c0_7 = arith.constant 0 : index
    %c0_8 = arith.constant 0 : index
    %9 = vector.load %arg4[%c0_7, %c0_8] : memref<128x128xbf16, #tpu.memory_space<vmem>>, vector<128x128xbf16>
    %cst_9 = arith.constant dense<0.000000e+00> : vector<128x128xf32>
    %10 = tpu.matmul %8, %9, %cst_9 {dimension_numbers = #tpu.dot_dimension_numbers<[1], [0], [0], [1], [0, 0, 1, 1], [], []>} : vector<128x128xbf16>, vector<128x128xbf16>, vector<128x128xf32> -> vector<128x128xf32>
    %c0_10 = arith.constant 0 : index
    %c0_11 = arith.constant 0 : index
    %11 = vector.load %arg5[%c0_10, %c0_11] : memref<1x128xf32, #tpu.memory_space<vmem>>, vector<1x128xf32>
    %12 = vector.broadcast %11 : vector<1x128xf32> to vector<128x128xf32>
    %13 = arith.addf %10, %12 : vector<128x128xf32>
    %14 = arith.truncf %13 : vector<128x128xf32> to vector<128x128xbf16>
    %c0_12 = arith.constant 0 : index
    %c0_13 = arith.constant 0 : index
    %15 = vector.load %arg11[%c0_12, %c0_13] : memref<128x128xbf16, #tpu.memory_space<vmem>>, vector<128x128xbf16>
    tpu.vector_store %arg11[%c0_12, %c0_13], %14 {strides = array<i32>} : memref<128x128xbf16, #tpu.memory_space<vmem>>, vector<128x128xbf16>,
    %c0_14 = arith.constant 0 : index
    %c0_15 = arith.constant 0 : index
    %16 = vector.load %arg6[%c0_14, %c0_15] : memref<128x128xbf16, #tpu.memory_space<vmem>>, vector<128x128xbf16>
    %cst_16 = arith.constant dense<0.000000e+00> : vector<128x128xf32>
    %17 = tpu.matmul %8, %16, %cst_16 {dimension_numbers = #tpu.dot_dimension_numbers<[1], [0], [0], [1], [0, 0, 1, 1], [], []>} : vector<128x128xbf16>, vector<128x128xbf16>, vector<128x128xf32> -> vector<128x128xf32>
    %c0_17 = arith.constant 0 : index
    %c0_18 = arith.constant 0 : index
    %18 = vector.load %arg7[%c0_17, %c0_18] : memref<1x128xf32, #tpu.memory_space<vmem>>, vector<1x128xf32>
    %19 = vector.broadcast %18 : vector<1x128xf32> to vector<128x128xf32>
    %20 = arith.addf %17, %19 : vector<128x128xf32>
    %21 = arith.truncf %20 : vector<128x128xf32> to vector<128x128xbf16>
    %c0_19 = arith.constant 0 : index
    %c0_20 = arith.constant 0 : index
    %22 = vector.load %arg12[%c0_19, %c0_20] : memref<128x128xbf16, #tpu.memory_space<vmem>>, vector<128x128xbf16>
    tpu.vector_store %arg12[%c0_19, %c0_20], %21 {strides = array<i32>} : memref<128x128xbf16, #tpu.memory_space<vmem>>, vector<128x128xbf16>,
    %c0_21 = arith.constant 0 : index
    %c0_22 = arith.constant 0 : index
    %23 = vector.load %arg8[%c0_21, %c0_22] : memref<128x128xbf16, #tpu.memory_space<vmem>>, vector<128x128xbf16>
    %cst_23 = arith.constant dense<0.000000e+00> : vector<128x128xf32>
    %24 = tpu.matmul %8, %23, %cst_23 {dimension_numbers = #tpu.dot_dimension_numbers<[1], [0], [0], [1], [0, 0, 1, 1], [], []>} : vector<128x128xbf16>, vector<128x128xbf16>, vector<128x128xf32> -> vector<128x128xf32>
    %c0_24 = arith.constant 0 : index
    %c0_25 = arith.constant 0 : index
    %25 = vector.load %arg9[%c0_24, %c0_25] : memref<1x128xf32, #tpu.memory_space<vmem>>, vector<1x128xf32>
    %26 = vector.broadcast %25 : vector<1x128xf32> to vector<128x128xf32>
    %27 = arith.addf %24, %26 : vector<128x128xf32>
    %28 = arith.truncf %27 : vector<128x128xf32> to vector<128x128xbf16>
    %c0_26 = arith.constant 0 : index
    %c0_27 = arith.constant 0 : index
    %29 = vector.load %arg13[%c0_26, %c0_27] : memref<128x128xbf16, #tpu.memory_space<vmem>>, vector<128x128xbf16>
    tpu.vector_store %arg13[%c0_26, %c0_27], %28 {strides = array<i32>} : memref<128x128xbf16, #tpu.memory_space<vmem>>, vector<128x128xbf16>,
    return
  }
  func.func @transform_0(%arg0: i32) -> (i32, i32) {
    %c0_i32 = arith.constant 0 : i32
    %c0_i32_0 = arith.constant 0 : i32
    return %arg0, %c0_i32 : i32, i32
  }
  func.func @transform_1(%arg0: i32) -> (i32, i32) {
    %c0_i32 = arith.constant 0 : i32
    %c0_i32_0 = arith.constant 0 : i32
    %c0_i32_1 = arith.constant 0 : i32
    return %c0_i32, %c0_i32_0 : i32, i32
  }
  func.func @transform_2(%arg0: i32) -> (i32, i32) {
    %c0_i32 = arith.constant 0 : i32
    %c0_i32_0 = arith.constant 0 : i32
    %c0_i32_1 = arith.constant 0 : i32
    return %c0_i32, %c0_i32_0 : i32, i32
  }
  func.func @transform_3(%arg0: i32) -> (i32, i32) {
    %c0_i32 = arith.constant 0 : i32
    %c0_i32_0 = arith.constant 0 : i32
    %c0_i32_1 = arith.constant 0 : i32
    return %c0_i32, %c0_i32_0 : i32, i32
  }
  func.func @transform_4(%arg0: i32) -> (i32, i32) {
    %c0_i32 = arith.constant 0 : i32
    %c0_i32_0 = arith.constant 0 : i32
    %c0_i32_1 = arith.constant 0 : i32
    return %c0_i32, %c0_i32_0 : i32, i32
  }
  func.func @transform_5(%arg0: i32) -> (i32, i32) {
    %c0_i32 = arith.constant 0 : i32
    %c0_i32_0 = arith.constant 0 : i32
    %c0_i32_1 = arith.constant 0 : i32
    return %c0_i32, %c0_i32_0 : i32, i32
  }
  func.func @transform_6(%arg0: i32) -> (i32, i32) {
    %c0_i32 = arith.constant 0 : i32
    %c0_i32_0 = arith.constant 0 : i32
    %c0_i32_1 = arith.constant 0 : i32
    return %c0_i32, %c0_i32_0 : i32, i32
  }
  func.func @transform_7(%arg0: i32) -> (i32, i32) {
    %c0_i32 = arith.constant 0 : i32
    %c0_i32_0 = arith.constant 0 : i32
    %c0_i32_1 = arith.constant 0 : i32
    return %c0_i32, %c0_i32_0 : i32, i32
  }
  func.func @transform_8(%arg0: i32) -> (i32, i32) {
    %c0_i32 = arith.constant 0 : i32
    %c0_i32_0 = arith.constant 0 : i32
    %c0_i32_1 = arith.constant 0 : i32
    return %c0_i32, %c0_i32_0 : i32, i32
  }
  func.func @transform_9(%arg0: i32) -> (i32, i32) {
    %c0_i32 = arith.constant 0 : i32
    %c0_i32_0 = arith.constant 0 : i32
    return %arg0, %c0_i32 : i32, i32
  }
  func.func @transform_10(%arg0: i32) -> (i32, i32) {
    %c0_i32 = arith.constant 0 : i32
    %c0_i32_0 = arith.constant 0 : i32
    return %arg0, %c0_i32 : i32, i32
  }
  func.func @transform_11(%arg0: i32) -> (i32, i32) {
    %c0_i32 = arith.constant 0 : i32
    %c0_i32_0 = arith.constant 0 : i32
    return %arg0, %c0_i32 : i32, i32
  }
  func.func @transform_12(%arg0: i32) -> (i32, i32) {
    %c0_i32 = arith.constant 0 : i32
    %c0_i32_0 = arith.constant 0 : i32
    return %arg0, %c0_i32 : i32, i32
  }
}

</mosaic_0001>

<bundles_post_ra>
// kernel: tpu_custom_call.1
= control target key start
LH: loop header
LB: loop body
LE: loop exit
PB: predicated region body
PF: predicated region fallthrough
CT: control target
= control target key end

     0   :  { %s2896_s0 = inlined_call_operand.vmem [shape: f32[384,16], index: 0, kind: input, shape index: {}]   ;;  %s2897_s1 = inlined_call_operand.vmem [shape: bf16[16,128], index: 1, kind: input, shape index: {}]   ;;  %s2898_s2 = inlined_call_operand.vmem [shape: f32[1,128], index: 2, kind: input, shape index: {}]   ;;  %s2899_s3 = inlined_call_operand.vmem [shape: bf16[128,128], index: 3, kind: input, shape index: {}]   ;;  %s2900_s4 = inlined_call_operand.vmem [shape: f32[1,128], index: 4, kind: input, shape index: {}]   ;;  %s2901_s5 = inlined_call_operand.vmem [shape: bf16[128,128], index: 5, kind: input, shape index: {}]   ;;  %s2902_s6 = inlined_call_operand.vmem [shape: f32[1,128], index: 6, kind: input, shape index: {}]   ;;  %s2903_s7 = inlined_call_operand.vmem [shape: bf16[128,128], index: 7, kind: input, shape index: {}]   ;;  %s2904_s8 = inlined_call_operand.vmem [shape: f32[1,128], index: 8, kind: input, shape index: {}]   ;;  %s2905_s9 = inlined_call_operand.hbm [shape: f32[384,128], index: 9, kind: output, shape index: {0}]   ;;  %s2906_s10 = inlined_call_operand.hbm [shape: bf16[384,128], index: 10, kind: output, shape index: {1}]   ;;  %s2907_s11 = inlined_call_operand.hbm [shape: bf16[384,128], index: 11, kind: output, shape index: {2}]   ;;  %s2908_s12 = inlined_call_operand.hbm [shape: bf16[384,128], index: 12, kind: output, shape index: {3}]  }
   0x1   :  { %2910 = sst [smem:[#allocation13_spill]] %s2896_s0 }
   0x2   :  { %2911 = sst [smem:[#allocation14_spill]] %s2897_s1 }
   0x3   :  { %2912 = sst [smem:[#allocation15_spill]] %s2898_s2 }
   0x4   :  { %2913 = sst [smem:[#allocation16_spill]] %s2899_s3 }
   0x5   :  { %2914 = sst [smem:[#allocation17_spill]] %s2900_s4 }
   0x6   :  { %18 = vsyncpa [#allocation3], 0 }
   0x7   :  { %20 = vsyncpa [#allocation3 + $0x1], 0 }
   0x8   :  { %21 = vsyncpa [#allocation5], 0 }
   0x9   :  { %23 = vsyncpa [#allocation5 + $0x1], 0 }
   0xa   :  { %24 = vsyncpa [#allocation8], 0 }
   0xb   :  { %26 = vsyncpa [#allocation8 + $0x1], 0  ;;  %s2409_s21 = smov 0   ;;  %s2411_s22 = smov 0  }
   0xc   :  { %s2413_s23 = smov 0   ;;  %s2415_s24 = smov 0  }
   0xd LB: > { %s2430_s25 = sadd.s32 4294967295, %s2334_s24   ;;  %s2909_s26 = sadd.s32 4294967294, %s2334_s24   ;;  %s2334_s24 = sphi %s2415_s24, %s2929_s24   ;;  %s2330_s23 = sphi %s2413_s23, %s2928_s23   ;;  %s2326_s22 = sphi %s2411_s22, %s2927_s22   ;;  %s2322_s21 = sphi %s2409_s21, %s2926_s21  }
   0xe   : > { %s2434_s27 = sadd.s32 1, %s2334_s24   ;;  %s233_s28 = sadd.s32 1, %s2330_s23 }
   0xf   : > { %s230_s29 = ssub.s32 %s2334_s24, %s2434_s27  ;;  %p243_p0 = scmp.ne.s32.totalorder %s2330_s23, %s2326_s22 }
  0x10   : > { %p231_p1 = scmp.eq.s32.totalorder %s230_s29, 0  ;;  %p244_p2 = scmp.eq.s32.totalorder %s2430_s25, 2 }
  0x11   : > { %p249_p3 = scmp.ne.s32.totalorder %s2326_s22, %s2322_s21  ;;  %p250_p4 = scmp.eq.s32.totalorder %s2909_s26, 2 }
  0x12   : > { %s2447_s30 = scalar_select %p231_p1, %s2330_s23, %s233_s28  }
  0x13   : > { %p2449_p5 = por %p244_p2, %p243_p0  ;;  %p2453_p6 = por %p250_p4, %p249_p3 }
  0x14   : > { %2915 = sst [smem:[#allocation12_spill]] %s2447_s30  ;;  %p1611_p7 = scmp.ge.s32.totalorder %s2334_s24, 1 }
  0x15   : > { %p379_p8 = scmp.lt.s32.totalorder %s2334_s24, 4 }
  0x17   : > { %p380_p9 = pnand %p1611_p7, %p379_p8 }
  0x18   : > { %s2918_s1 = sld [smem:[#allocation14_spill]] (!%p380_p9)  ;;  %s1616_s17 = sshll.u32 (!%p380_p9), %s2430_s25, 4  ;;  %v2157_v2 = vld [vmem:[%s2901_s5] sm:$0xff] (!%p380_p9)   ;;  %vm486_vm0 = vcmask (!%p380_p9), 130048   ;;  %v2159_v14 = vld [vmem:[%s2901_s5 + $0x8] sm:$0xff] (!%p380_p9)   ;;  %v2161_v19 = vld [vmem:[%s2901_s5 + $0x10] sm:$0xff] (!%p380_p9)  }
  0x19   : > { %383 = sbr.rel (%p380_p9) target bundleno = 573 (0x23d), region = 56  ;;  %p437_p10 = scmp.lt.s32.totalorder (!%p380_p9), %s1616_s17, 47  ;;  %v2163_v24 = vld [vmem:[%s2901_s5 + $0x18] sm:$0xff] (!%p380_p9)   ;;  %v2165_v30 = vld [vmem:[%s2901_s5 + $0x20] sm:$0xff] (!%p380_p9)   ;;  %v2167_v32 = vld [vmem:[%s2901_s5 + $0x28] sm:$0xff] (!%p380_p9)  }
  0x1a   : > { %s2919_s3 = sld [smem:[#allocation16_spill]] (!%p380_p9)  ;;  %s2920_s0 = sld [smem:[#allocation13_spill]] (!%p380_p9)  ;;  %v2169_v38 = vld [vmem:[%s2901_s5 + $0x30] sm:$0xff] (!%p380_p9)   ;;  %v2171_v40 = vld [vmem:[%s2901_s5 + $0x38] sm:$0xff] (!%p380_p9)   ;;  %v2172_v41 = vld [vmem:[%s2903_s7] sm:$0xff] (!%p380_p9)  }
  0x1b   : > { %s2544_s29 = sand.u32 (!%p380_p9), 1, %s2326_s22   ;;  %s2921_s2 = sld [smem:[#allocation15_spill]] (!%p380_p9)  ;;  %v2173_v53 = vld [vmem:[%s2903_s7 + $0x8] sm:$0xff] (!%p380_p9)   ;;  %v2174_v61 = vld [vmem:[%s2903_s7 + $0x10] sm:$0xff] (!%p380_p9)  }
  0x1c   : > { %s1765_s28 = sshll.u32 (!%p380_p9), %s2430_s25, 11 }
  0x1d   : > { %s2631_s18 = scalar_lea.hbm (!%p380_p9), %s2905_s9, %s1765_s28 }
  0x1e   : > { %v2155_v0 = vld [vmem:[%s2918_s1] sm:$0xff] (!%p380_p9)   ;;  %s1377_s1 = scalar_lea.sflag (!%p380_p9), [#allocation3], %s2544_s29 }
  0x1f   : > { %1967 = vmatprep.subr.bf16.mxu0 (!%p380_p9), %v2155_v0 }
  0x20   : > { %v2156_v1 = vld [vmem:[%s2919_s3] sm:$0xff]   ;;  %1968 = vmatpush3.bf16.msra.mxu0 %v2155_v0  ;;  %s2931_s17 = smov (!%p437_p10, %s1616_s17), 47  ;;  %v2158_v3 = vld [vmem:[%s2919_s3 + $0x8] sm:$0xff]   ;;  %v2160_v4 = vld [vmem:[%s2919_s3 + $0x10] sm:$0xff]  }
  0x21   : > { %1985 = vmatprep.subr.bf16.mxu1 %v2156_v1  ;;  %s1617_s15 = sshll.u32 %s2931_s17, 3  ;;  %2017 = vmatprep.subr.bf16.mxu0 %v2157_v2  ;;  %v2162_v20 = vld [vmem:[%s2919_s3 + $0x18] sm:$0xff]   ;;  %v2164_v22 = vld [vmem:[%s2919_s3 + $0x20] sm:$0xff]   ;;  %v2166_v27 = vld [vmem:[%s2919_s3 + $0x28] sm:$0xff]   ;;  %s2336_s17 = smov [#allocation2]  }
  0x22   : > { %1986 = vmatpush3.bf16.msra.mxu1 %v2156_v1  ;;  %s2475_s30 = scalar_lea.vmem %s2920_s0, %s1617_s15  ;;  %v2168_v37 = vld [vmem:[%s2919_s3 + $0x30] sm:$0xff]   ;;  %v2170_v39 = vld [vmem:[%s2919_s3 + $0x38] sm:$0xff]   ;;  %s1612_s15 = sshll.u32 %s2544_s29, 7  ;;  %v2550_v42 = vld [vmem:[%s2921_s2] ss:$0 sm:$0xff] }
  0x23   : > { %1987 = vmatprep.subr.bf16.mxu1 %v2158_v3  ;;  %v447_v5 = vld [vmem:[%s2475_s30] sm:$0xff]  ;;  %v448_v6 = vld [vmem:[%s2475_s30 + $0x8] sm:$0xff]  ;;  %v449_v7 = vld [vmem:[%s2475_s30 + $0x10] sm:$0xff]  ;;  %s2554_s19 = scalar_lea.vmem [#allocation2], %s1612_s15  ;;  %s2184_s20 = sshll.u32 %s2336_s17, 4  ;;  %s2185_s20 = int_to_ptr.vmem [resolvable:$false] %s2184_s20 }
  0x24   : > { %v463_v8 = vpack.c.bf16 %v448_v6, %v447_v5  ;;  %v450_v9 = vld [vmem:[%s2475_s30 + $0x18] sm:$0xff]  ;;  %v451_v10 = vld [vmem:[%s2475_s30 + $0x20] sm:$0xff]  ;;  %v452_v11 = vld [vmem:[%s2475_s30 + $0x28] sm:$0xff]  ;;  %s2186_s0 = scalar_lea.vmem %s2185_s20, 4096 }
  0x25   : > { %v464_v12 = vpack.c.bf16 %v450_v9, %v449_v7  ;;  %v465_v13 = vpack.c.bf16 %v452_v11, %v451_v10  ;;  %v453_v15 = vld [vmem:[%s2475_s30 + $0x30] sm:$0xff]  ;;  %v454_v16 = vld [vmem:[%s2475_s30 + $0x38] sm:$0xff]  ;;  %v455_v17 = vld [vmem:[%s2475_s30 + $0x40] sm:$0xff] }
  0x26   : > { %1988 = vmatpush3.bf16.msra.mxu1 %v2158_v3  ;;  %1969 = vmatprep.mubr.msk.bf16.mxu0 %vm486_vm0, %v463_v8  ;;  %v456_v18 = vld [vmem:[%s2475_s30 + $0x48] sm:$0xff]  ;;  %v466_v21 = vpack.c.bf16 %v454_v16, %v453_v15  ;;  %v457_v25 = vld [vmem:[%s2475_s30 + $0x50] sm:$0xff]  ;;  %v458_v26 = vld [vmem:[%s2475_s30 + $0x58] sm:$0xff] }
  0x27   : > { %1989 = vmatprep.subr.bf16.mxu1 %v2160_v4  ;;  %1970 = vmatmul.mubr.msk.bf16.vlgmr.msra.gmra.mrb[0].mxu0 %vm486_vm0, %v464_v12  ;;  %v467_v23 = vpack.c.bf16 %v456_v18, %v455_v17  ;;  %v459_v28 = vld [vmem:[%s2475_s30 + $0x60] sm:$0xff]  ;;  %v460_v29 = vld [vmem:[%s2475_s30 + $0x68] sm:$0xff]  ;;  %v468_v31 = vpack.c.bf16 %v458_v26, %v457_v25  ;;  %v461_v34 = vld [vmem:[%s2475_s30 + $0x70] sm:$0xff] }
  0x28   : > { %1973 = vmatprep.mubr.msk.bf16.mxu0 %vm486_vm0, %v465_v13  ;;  %2018 = vmatpush3.bf16.msra.mxu0 %v2157_v2  ;;  %v469_v33 = vpack.c.bf16 %v460_v29, %v459_v28  ;;  %v462_v35 = vld [vmem:[%s2475_s30 + $0x78] sm:$0xff]  ;;  %v2176_v9 = vld [vmem:[%s2903_s7 + $0x20] sm:$0xff]   ;;  %v2177_v13 = vld [vmem:[%s2903_s7 + $0x28] sm:$0xff]   ;;  %s1405_s30 = sshll.u32 %s2554_s19, 4  ;;  %s2634_s30 = int_to_ptr.vmem [resolvable:$true] %s1405_s30 }
  0x29   : > { %2019 = vmatprep.subr.bf16.mxu0 %v2159_v14  ;;  %v470_v36 = vpack.c.bf16 %v462_v35, %v461_v34  ;;  %v2175_v1 = vld [vmem:[%s2903_s7 + $0x18] sm:$0xff]   ;;  %s2180_s26 = scalar_lea.vmem %s2634_s30, 2048  ;;  %p2187_p0 = scmp.lt.s32.totalorder %s2634_s30, %s2185_s20 }
  0x2a   : > { %1990 = vmatpush3.bf16.msra.mxu1 %v2160_v4  ;;  %v2179_v25 = vld [vmem:[%s2903_s7 + $0x38] sm:$0xff]   ;;  %p2181_p11 = scmp.ne.s32.totalorder %s2634_s30, %s2180_s26  ;;  %p2188_p1 = scmp.lt.s32.totalorder %s2186_s0, %s2180_s26 }
  0x2b   : > { %1991 = vmatprep.subr.bf16.mxu1 %v2162_v20 }
  0x2c   : > { %2020 = vmatpush3.bf16.msra.mxu0 %v2159_v14  ;;  %p2182_p12 = pnand %p2181_p11, %p2449_p5  ;;  %p2189_p2 = por %p2188_p1, %p2187_p0 }
  0x2d   : > { %2021 = vmatprep.subr.bf16.mxu0 %v2161_v19 }
  0x2e   : > { %1992 = vmatpush3.bf16.msra.mxu1 %v2162_v20  ;;  %p2183_p13 = pneg %p2182_p12 }
  0x2f   : > { %1993 = vmatprep.subr.bf16.mxu1 %v2164_v22  ;;  %1974 = vmatmul.mubr.msk.bf16.gmra.mrb[4].mxu0 %vm486_vm0, %v466_v21  ;;  %v2178_v21 = vld [vmem:[%s2903_s7 + $0x30] sm:$0xff]  }
  0x30   : > { %1977 = vmatprep.mubr.msk.bf16.mxu0 %vm486_vm0, %v467_v23  ;;  %2022 = vmatpush3.bf16.msra.mxu0 %v2161_v19  ;;  %p2190_p3 = pnand %p2189_p2, %p2183_p13 }
  0x31   : > { %2023 = vmatprep.subr.bf16.mxu0 %v2163_v24 }
  0x32   : > { %1994 = vmatpush3.bf16.msra.mxu1 %v2164_v22 }
  0x33   : > { %1995 = vmatprep.subr.bf16.mxu1 %v2166_v27 }
  0x34   : > { %2024 = vmatpush3.bf16.msra.mxu0 %v2163_v24 }
  0x35   : > { %2025 = vmatprep.subr.bf16.mxu0 %v2165_v30 }
  0x36   : > { %1996 = vmatpush3.bf16.msra.mxu1 %v2166_v27 }
  0x37   : > { %1978 = vmatmul.mubr.msk.bf16.gmra.mrb[8].mxu0 %vm486_vm0, %v468_v31  ;;  %1997 = vmatprep.subr.bf16.mxu1 %v2168_v37 }
  0x38   : > { %1981 = vmatprep.mubr.msk.bf16.mxu0 %vm486_vm0, %v469_v33  ;;  %2026 = vmatpush3.bf16.msra.mxu0 %v2165_v30 }
  0x39   : > { %2027 = vmatprep.subr.bf16.mxu0 %v2167_v32 }
  0x3a   : > { %1998 = vmatpush3.bf16.msra.mxu1 %v2168_v37 }
  0x3b   : > { %1999 = vmatprep.subr.bf16.mxu1 %v2170_v39 }
  0x3c   : > { %2028 = vmatpush3.bf16.msra.mxu0 %v2167_v32 }
  0x3d   : > { %2029 = vmatprep.subr.bf16.mxu0 %v2169_v38 }
  0x3e   : > { %2000 = vmatpush3.bf16.msra.mxu1 %v2170_v39 }
  0x3f   : > { %1982 = vmatmul.mubr.msk.bf16.gmra.mrb[12].mxu0 %vm486_vm0, %v470_v36  ;;  %2081 = vmatprep.subr.bf16.mxu1 %v2172_v41 }
  0x40   : > { %2030 = vmatpush3.bf16.msra.mxu0 %v2169_v38 }
  0x41   : > { %2031 = vmatprep.subr.bf16.mxu0 %v2171_v40 }
  0x44   : > { %2032 = vmatpush3.bf16.msra.mxu0 %v2171_v40 }
  0x45   : > { %2049 = vmatprep.subr.bf16.mxu0 %v2172_v41 }
  0xfa   : > { %v1971_v43 = vpop.f32.mrb[0].mxu0 }
  0xfb   : > { %v554_v44 = vadd.f32 %v1971_v43, %v2550_v42  ;;  %v545_v45 = vpop.f32.mrb[1].mxu0 }
  0xfc   : > { %v546_v46 = vadd.f32 %v2550_v42, %v545_v45  ;;  %v1972_v47 = vpop.f32.mrb[2].mxu0 }
  0xfd   : > { %610 = vst [vmem:[%s2554_s19 + $0x10] sm:$0xff] %v554_v44  ;;  %v557_v48 = vadd.f32 %v1972_v47, %v2550_v42  ;;  %v548_v49 = vpop.f32.mrb[3].mxu0 }
  0xfe   : > { %608 = vst [vmem:[%s2554_s19] sm:$0xff] %v546_v46  ;;  %v549_v50 = vadd.f32 %v2550_v42, %v548_v49 }
  0xff   : > { %611 = vst [vmem:[%s2554_s19 + $0x18] sm:$0xff] %v557_v48  ;;  %v2561_v51 = vpack.c.bf16 %v557_v48, %v554_v44 }
 0x100   : > { %609 = vst [vmem:[%s2554_s19 + $0x8] sm:$0xff] %v549_v50  ;;  %v2564_v52 = vpack.c.bf16 %v549_v50, %v546_v46 }
 0x102   : > { %v1975_v54 = vpop.f32.mrb[4].mxu0  ;;  %2001 = vmatprep.mubr.bf16.mxu1 %v2564_v52  ;;  %2033 = vmatprep.mubr.bf16.mxu0 %v2564_v52 }
 0x103   : > { %v570_v55 = vadd.f32 %v1975_v54, %v2550_v42  ;;  %v561_v56 = vpop.f32.mrb[5].mxu0  ;;  %2002 = vmatmul.mubr.bf16.vlgmr.msra.gmra.mrb[0].mxu1 %v2561_v51  ;;  %2034 = vmatmul.mubr.bf16.vlgmr.msra.gmra.mrb[16].mxu0 %v2561_v51 }
 0x104   : > { %v562_v57 = vadd.f32 %v2550_v42, %v561_v56  ;;  %2089 = vmatpush3.bf16.msra.mxu1 %v2172_v41  ;;  %v1976_v58 = vpop.f32.mrb[6].mxu0  ;;  %2050 = vmatpush3.bf16.msra.mxu0 %v2172_v41 }
 0x105   : > { %614 = vst [vmem:[%s2554_s19 + $0x30] sm:$0xff] %v570_v55  ;;  %v573_v59 = vadd.f32 %v1976_v58, %v2550_v42  ;;  %v564_v60 = vpop.f32.mrb[7].mxu0  ;;  %2082 = vmatprep.subr.bf16.mxu1 %v2173_v53  ;;  %2051 = vmatprep.subr.bf16.mxu0 %v2173_v53 }
 0x106   : > { %612 = vst [vmem:[%s2554_s19 + $0x20] sm:$0xff] %v562_v57  ;;  %v565_v62 = vadd.f32 %v2550_v42, %v564_v60 }
 0x107   : > { %615 = vst [vmem:[%s2554_s19 + $0x38] sm:$0xff] %v573_v59  ;;  %v2583_v63 = vpack.c.bf16 %v573_v59, %v570_v55 }
 0x108   : > { %613 = vst [vmem:[%s2554_s19 + $0x28] sm:$0xff] %v565_v62  ;;  %v2586_v0 = vpack.c.bf16 %v565_v62, %v562_v57  ;;  %2090 = vmatpush3.bf16.msra.mxu1 %v2173_v53  ;;  %2052 = vmatpush3.bf16.msra.mxu0 %v2173_v53 }
 0x109   : > { %2083 = vmatprep.subr.bf16.mxu1 %v2174_v61  ;;  %2053 = vmatprep.subr.bf16.mxu0 %v2174_v61 }
 0x10a   : > { %v1979_v2 = vpop.f32.mrb[8].mxu0  ;;  %2005 = vmatprep.mubr.bf16.mxu1 %v2586_v0  ;;  %2037 = vmatprep.mubr.bf16.mxu0 %v2586_v0 }
 0x10b   : > { %v586_v3 = vadd.f32 %v1979_v2, %v2550_v42  ;;  %v577_v4 = vpop.f32.mrb[9].mxu0  ;;  %2006 = vmatmul.mubr.bf16.gmra.mrb[4].mxu1 %v2583_v63  ;;  %2038 = vmatmul.mubr.bf16.gmra.mrb[20].mxu0 %v2583_v63 }
 0x10c   : > { %v578_v5 = vadd.f32 %v2550_v42, %v577_v4  ;;  %2091 = vmatpush3.bf16.msra.mxu1 %v2174_v61  ;;  %v1980_v6 = vpop.f32.mrb[10].mxu0  ;;  %2054 = vmatpush3.bf16.msra.mxu0 %v2174_v61 }
 0x10d   : > { %618 = vst [vmem:[%s2554_s19 + $0x50] sm:$0xff] %v586_v3  ;;  %v589_v7 = vadd.f32 %v1980_v6, %v2550_v42  ;;  %v580_v8 = vpop.f32.mrb[11].mxu0  ;;  %2084 = vmatprep.subr.bf16.mxu1 %v2175_v1  ;;  %2055 = vmatprep.subr.bf16.mxu0 %v2175_v1 }
 0x10e   : > { %616 = vst [vmem:[%s2554_s19 + $0x40] sm:$0xff] %v578_v5  ;;  %v581_v10 = vadd.f32 %v2550_v42, %v580_v8 }
 0x10f   : > { %619 = vst [vmem:[%s2554_s19 + $0x58] sm:$0xff] %v589_v7  ;;  %v629_v11 = vpack.c.bf16 %v589_v7, %v586_v3 }
 0x110   : > { %617 = vst [vmem:[%s2554_s19 + $0x48] sm:$0xff] %v581_v10  ;;  %v628_v12 = vpack.c.bf16 %v581_v10, %v578_v5  ;;  %2092 = vmatpush3.bf16.msra.mxu1 %v2175_v1  ;;  %2056 = vmatpush3.bf16.msra.mxu0 %v2175_v1 }
 0x111   : > { %2085 = vmatprep.subr.bf16.mxu1 %v2176_v9  ;;  %2057 = vmatprep.subr.bf16.mxu0 %v2176_v9 }
 0x112   : > { %v1983_v14 = vpop.f32.mrb[12].mxu0  ;;  %2009 = vmatprep.mubr.bf16.mxu1 %v628_v12  ;;  %2041 = vmatprep.mubr.bf16.mxu0 %v628_v12 }
 0x113   : > { %v602_v15 = vadd.f32 %v1983_v14, %v2550_v42  ;;  %v593_v16 = vpop.f32.mrb[13].mxu0  ;;  %2010 = vmatmul.mubr.bf16.gmra.mrb[8].mxu1 %v629_v11  ;;  %2042 = vmatmul.mubr.bf16.gmra.mrb[24].mxu0 %v629_v11 }
 0x114   : > { %v594_v17 = vadd.f32 %v2550_v42, %v593_v16  ;;  %2093 = vmatpush3.bf16.msra.mxu1 %v2176_v9  ;;  %v1984_v18 = vpop.f32.mrb[14].mxu0  ;;  %2058 = vmatpush3.bf16.msra.mxu0 %v2176_v9 }
 0x115   : > { %622 = vst [vmem:[%s2554_s19 + $0x70] sm:$0xff] %v602_v15  ;;  %v605_v19 = vadd.f32 %v1984_v18, %v2550_v42  ;;  %v596_v20 = vpop.f32.mrb[15].mxu0  ;;  %2086 = vmatprep.subr.bf16.mxu1 %v2177_v13  ;;  %2059 = vmatprep.subr.bf16.mxu0 %v2177_v13 }
 0x116   : > { %620 = vst [vmem:[%s2554_s19 + $0x60] sm:$0xff] %v594_v17  ;;  %v597_v22 = vadd.f32 %v2550_v42, %v596_v20 }
 0x117   : > { %623 = vst [vmem:[%s2554_s19 + $0x78] sm:$0xff] %v605_v19  ;;  %v631_v23 = vpack.c.bf16 %v605_v19, %v602_v15 }
 0x118   : > { %621 = vst [vmem:[%s2554_s19 + $0x68] sm:$0xff] %v597_v22  ;;  %v630_v24 = vpack.c.bf16 %v597_v22, %v594_v17  ;;  %2094 = vmatpush3.bf16.msra.mxu1 %v2177_v13  ;;  %2060 = vmatpush3.bf16.msra.mxu0 %v2177_v13 }
 0x119   : > { %2087 = vmatprep.subr.bf16.mxu1 %v2178_v21  ;;  %2061 = vmatprep.subr.bf16.mxu0 %v2178_v21 }
 0x11a   : > { %2013 = vmatprep.mubr.bf16.mxu1 %v630_v24  ;;  %2045 = vmatprep.mubr.bf16.mxu0 %v630_v24 }
 0x11b   : > { %2014 = vmatmul.mubr.bf16.gmra.mrb[12].mxu1 %v631_v23  ;;  %2046 = vmatmul.mubr.bf16.gmra.mrb[28].mxu0 %v631_v23 }
 0x11c   : > { %2095 = vmatpush3.bf16.msra.mxu1 %v2178_v21  ;;  %2062 = vmatpush3.bf16.msra.mxu0 %v2178_v21 }
 0x11d   : > { %2065 = vmatprep.mubr.bf16.mxu0 %v2564_v52  ;;  %2069 = vmatprep.mubr.bf16.mxu1 %v2586_v0 }
 0x11e   : > { %2088 = vmatprep.subr.bf16.mxu1 %v2179_v25  ;;  %2063 = vmatprep.subr.bf16.mxu0 %v2179_v25 }
 0x120   : > { %2096 = vmatpush3.bf16.msra.mxu1 %v2179_v25  ;;  %2064 = vmatpush3.bf16.msra.mxu0 %v2179_v25 }
 0x123   : > { %2066 = vmatmul.mubr.bf16.vlgmr.msra.gmra.mrb[32].mxu0 %v2561_v51  ;;  %2070 = vmatmul.mubr.bf16.vlgmr.msra.gmra.mrb[16].mxu1 %v2583_v63 }
 0x124   : > { %2073 = vmatprep.mubr.bf16.mxu1 %v628_v12 }
 0x12b   : > { %2074 = vmatmul.mubr.bf16.gmra.mrb[20].mxu1 %v629_v11 }
 0x12c   : > { %2077 = vmatprep.mubr.bf16.mxu1 %v630_v24 }
 0x133   : > { %2078 = vmatmul.mubr.bf16.gmra.mrb[24].mxu1 %v631_v23 }
 0x134   : > { %2193 = shalt.err (!%p2190_p3)
}
 0x135   : > { %s2194_s19 = scalar_lea.hbm %s2631_s18, 2048  ;;  %s2198_s16 = scalar_lea.hbm %s2905_s9, 6144 }
 0x136   : > { %p2195_p4 = scmp.ne.s32.totalorder %s2631_s18, %s2194_s19  ;;  %p2199_p9 = scmp.lt.u32.totalorder %s2631_s18, %s2905_s9 }
 0x137   : > { %p2200_p10 = scmp.lt.u32.totalorder %s2198_s16, %s2194_s19  ;;  %p2202_p12 = scmp.lt.u32.totalorder %s2194_s19, %s2631_s18 }
 0x138   : > { %p2196_p7 = pnand %p2195_p4, %p2449_p5 }
 0x139   : > { %p2201_p11 = por %p2200_p10, %p2199_p9 }
 0x13a   : > { %p2197_p8 = pneg %p2196_p7 }
 0x13b   : > { %p2203_p13 = por %p2202_p12, %p2201_p11 }
 0x13d   : > { %p2204_p0 = pnand %p2203_p13, %p2197_p8 }
 0x13f   : > { %2207 = shalt.err (!%p2204_p0)
}
 0x140   : > { %s2337_s0 = smov 128   ;;  %s2338_s26 = smov 8   ;;  %v2668_v29 = vld [vmem:[%s2902_s6] ss:$0 sm:$0xff] }
 0x141   : > { %2097 = dma.vmem_to_hbm [thread:$0]  (%p2449_p5), %s2634_s30, 2048, %s2631_s18, %s1377_s1, %s2337_s0, %s2337_s0, %s2338_s26  }
 0x142   : > { %s2922_s4 = sld [smem:[#allocation17_spill]]  ;;  %s2671_s17 = sshll.u32 %s2544_s29, 6 }
 0x143   : > { %s2682_s18 = scalar_lea.vmem [#allocation4], %s2671_s17  ;;  %s2686_s30 = scalar_lea.vmem [#allocation6], %s2671_s17 }
 0x144   : > { %s2717_s20 = sshll.u32 %s2430_s25, 10  ;;  %s1421_s0 = sshll.u32 %s2682_s18, 4  ;;  %s2735_s0 = int_to_ptr.vmem [resolvable:$true] %s1421_s0 }
 0x145   : > { %s1437_s26 = sshll.u32 %s2686_s30, 4  ;;  %s2733_s19 = scalar_lea.hbm %s2906_s10, %s2717_s20  ;;  %s2737_s26 = int_to_ptr.vmem [resolvable:$true] %s1437_s26 }
 0x146   : > { %s2745_s2 = scalar_lea.hbm %s2907_s11, %s2717_s20  ;;  %s2923_s3 = sand.u32 1, %s2430_s25  }
 0x147   : > { %s2208_s1 = scalar_lea.vmem %s2735_s0, 1024 }
 0x148   : > { %v2663_v27 = vld [vmem:[%s2922_s4] ss:$0 sm:$0xff]  ;;  %s2760_s4 = scalar_lea.sflag [#allocation5], %s2923_s3  ;;  %p2209_p1 = scmp.ne.s32.totalorder %s2735_s0, %s2208_s1 }
 0x14a   : > { %p2210_p2 = pnand %p2209_p1, %p2449_p5 }
 0x14c   : > { %p2211_p3 = pneg %p2210_p2 }
 0x1d6   : > { %v2003_v26 = vpop.f32.mrb[0].mxu1  ;;  %v2035_v28 = vpop.f32.mrb[16].mxu0 }
 0x1d7   : > { %v737_v30 = vpop.f32.mrb[1].mxu1  ;;  %v985_v31 = vpop.f32.mrb[17].mxu0  ;;  %v746_v34 = vadd.f32 %v2003_v26, %v2663_v27  ;;  %v994_v35 = vadd.f32 %v2035_v28, %v2668_v29 }
 0x1d8   : > { %v2004_v32 = vpop.f32.mrb[2].mxu1  ;;  %v2036_v33 = vpop.f32.mrb[18].mxu0  ;;  %v738_v40 = vadd.f32 %v2663_v27, %v737_v30  ;;  %v986_v41 = vadd.f32 %v2668_v29, %v985_v31 }
 0x1d9   : > { %v749_v36 = vadd.f32 %v2004_v32, %v2663_v27  ;;  %v997_v37 = vadd.f32 %v2036_v33, %v2668_v29  ;;  %v740_v38 = vpop.f32.mrb[3].mxu1  ;;  %v988_v39 = vpop.f32.mrb[19].mxu0 }
 0x1da   : > { %v741_v42 = vadd.f32 %v2663_v27, %v740_v38  ;;  %v989_v43 = vadd.f32 %v2668_v29, %v988_v39 }
 0x1db   : > { %v1777_v44 = vpack.c.bf16 %v749_v36, %v746_v34  ;;  %v1817_v45 = vpack.c.bf16 %v997_v37, %v994_v35 }
 0x1dc   : > { %v1772_v46 = vpack.c.bf16 %v741_v42, %v738_v40  ;;  %v1812_v47 = vpack.c.bf16 %v989_v43, %v986_v41 }
 0x1dd   : > { %1889 = vst [vmem:[%s2682_s18 + $0x8] sm:$0xff] %v1777_v44   ;;  %1896 = vst [vmem:[%s2686_s30 + $0x8] sm:$0xff] %v1817_v45  }
 0x1de   : > { %1773 = vst [vmem:[%s2682_s18] sm:$0xff] %v1772_v46   ;;  %1813 = vst [vmem:[%s2686_s30] sm:$0xff] %v1812_v47   ;;  %v2007_v48 = vpop.f32.mrb[4].mxu1  ;;  %v2039_v49 = vpop.f32.mrb[20].mxu0 }
 0x1df   : > { %v753_v50 = vpop.f32.mrb[5].mxu1  ;;  %v1001_v51 = vpop.f32.mrb[21].mxu0  ;;  %v762_v54 = vadd.f32 %v2007_v48, %v2663_v27  ;;  %v1010_v55 = vadd.f32 %v2039_v49, %v2668_v29 }
 0x1e0   : > { %v2008_v52 = vpop.f32.mrb[6].mxu1  ;;  %v2040_v53 = vpop.f32.mrb[22].mxu0  ;;  %v754_v60 = vadd.f32 %v2663_v27, %v753_v50  ;;  %v1002_v61 = vadd.f32 %v2668_v29, %v1001_v51 }
 0x1e1   : > { %v765_v56 = vadd.f32 %v2008_v52, %v2663_v27  ;;  %v1013_v57 = vadd.f32 %v2040_v53, %v2668_v29  ;;  %v756_v58 = vpop.f32.mrb[7].mxu1  ;;  %v1004_v59 = vpop.f32.mrb[23].mxu0 }
 0x1e2   : > { %v757_v62 = vadd.f32 %v2663_v27, %v756_v58  ;;  %v1005_v63 = vadd.f32 %v2668_v29, %v1004_v59 }
 0x1e3   : > { %v1787_v0 = vpack.c.bf16 %v765_v56, %v762_v54  ;;  %v1827_v1 = vpack.c.bf16 %v1013_v57, %v1010_v55 }
 0x1e4   : > { %v1782_v2 = vpack.c.bf16 %v757_v62, %v754_v60  ;;  %v1822_v3 = vpack.c.bf16 %v1005_v63, %v1002_v61 }
 0x1e5   : > { %1891 = vst [vmem:[%s2682_s18 + $0x18] sm:$0xff] %v1787_v0   ;;  %1898 = vst [vmem:[%s2686_s30 + $0x18] sm:$0xff] %v1827_v1  }
 0x1e6   : > { %1890 = vst [vmem:[%s2682_s18 + $0x10] sm:$0xff] %v1782_v2   ;;  %1897 = vst [vmem:[%s2686_s30 + $0x10] sm:$0xff] %v1822_v3   ;;  %v2011_v4 = vpop.f32.mrb[8].mxu1  ;;  %v2043_v5 = vpop.f32.mrb[24].mxu0 }
 0x1e7   : > { %v769_v6 = vpop.f32.mrb[9].mxu1  ;;  %v1017_v7 = vpop.f32.mrb[25].mxu0  ;;  %v778_v10 = vadd.f32 %v2011_v4, %v2663_v27  ;;  %v1026_v11 = vadd.f32 %v2043_v5, %v2668_v29 }
 0x1e8   : > { %v2012_v8 = vpop.f32.mrb[10].mxu1  ;;  %v2044_v9 = vpop.f32.mrb[26].mxu0  ;;  %v770_v16 = vadd.f32 %v2663_v27, %v769_v6  ;;  %v1018_v17 = vadd.f32 %v2668_v29, %v1017_v7 }
 0x1e9   : > { %v781_v12 = vadd.f32 %v2012_v8, %v2663_v27  ;;  %v1029_v13 = vadd.f32 %v2044_v9, %v2668_v29  ;;  %v772_v14 = vpop.f32.mrb[11].mxu1  ;;  %v1020_v15 = vpop.f32.mrb[27].mxu0 }
 0x1ea   : > { %v773_v18 = vadd.f32 %v2663_v27, %v772_v14  ;;  %v1021_v19 = vadd.f32 %v2668_v29, %v1020_v15 }
 0x1eb   : > { %v1797_v20 = vpack.c.bf16 %v781_v12, %v778_v10  ;;  %v1837_v21 = vpack.c.bf16 %v1029_v13, %v1026_v11 }
 0x1ec   : > { %v1792_v22 = vpack.c.bf16 %v773_v18, %v770_v16  ;;  %v1832_v23 = vpack.c.bf16 %v1021_v19, %v1018_v17 }
 0x1ed   : > { %1893 = vst [vmem:[%s2682_s18 + $0x28] sm:$0xff] %v1797_v20   ;;  %1900 = vst [vmem:[%s2686_s30 + $0x28] sm:$0xff] %v1837_v21  }
 0x1ee   : > { %1892 = vst [vmem:[%s2682_s18 + $0x20] sm:$0xff] %v1792_v22   ;;  %1899 = vst [vmem:[%s2686_s30 + $0x20] sm:$0xff] %v1832_v23   ;;  %v2015_v24 = vpop.f32.mrb[12].mxu1  ;;  %v2047_v25 = vpop.f32.mrb[28].mxu0 }
 0x1ef   : > { %v785_v26 = vpop.f32.mrb[13].mxu1  ;;  %v1033_v28 = vpop.f32.mrb[29].mxu0  ;;  %v794_v32 = vadd.f32 %v2015_v24, %v2663_v27  ;;  %v1042_v33 = vadd.f32 %v2047_v25, %v2668_v29 }
 0x1f0   : > { %v2016_v30 = vpop.f32.mrb[14].mxu1  ;;  %v2048_v31 = vpop.f32.mrb[30].mxu0  ;;  %v786_v38 = vadd.f32 %v2663_v27, %v785_v26  ;;  %v1034_v39 = vadd.f32 %v2668_v29, %v1033_v28 }
 0x1f1   : > { %v797_v34 = vadd.f32 %v2016_v30, %v2663_v27  ;;  %v1045_v35 = vadd.f32 %v2048_v31, %v2668_v29  ;;  %v788_v36 = vpop.f32.mrb[15].mxu1  ;;  %v1036_v37 = vpop.f32.mrb[31].mxu0 }
 0x1f2   : > { %v789_v40 = vadd.f32 %v2663_v27, %v788_v36  ;;  %v1037_v41 = vadd.f32 %v2668_v29, %v1036_v37  ;;  %v2752_v29 = vld [vmem:[%s2904_s8] ss:$0 sm:$0xff] }
 0x1f3   : > { %v1807_v42 = vpack.c.bf16 %v797_v34, %v794_v32  ;;  %v1847_v43 = vpack.c.bf16 %v1045_v35, %v1042_v33 }
 0x1f4   : > { %v1802_v44 = vpack.c.bf16 %v789_v40, %v786_v38  ;;  %v1842_v45 = vpack.c.bf16 %v1037_v41, %v1034_v39 }
 0x1f5   : > { %1895 = vst [vmem:[%s2682_s18 + $0x38] sm:$0xff] %v1807_v42   ;;  %1902 = vst [vmem:[%s2686_s30 + $0x38] sm:$0xff] %v1847_v43  }
 0x1f6   : > { %1894 = vst [vmem:[%s2682_s18 + $0x30] sm:$0xff] %v1802_v44   ;;  %1901 = vst [vmem:[%s2686_s30 + $0x30] sm:$0xff] %v1842_v45   ;;  %v2067_v27 = vpop.f32.mrb[32].mxu0  ;;  %v2071_v46 = vpop.f32.mrb[16].mxu1  ;;  %s2339_s18 = smov [#allocation4]  }
 0x1f7   : > { %v2754_v47 = vpop.f32.mrb[33].mxu0  ;;  %v2756_v48 = vpop.f32.mrb[17].mxu1  ;;  %s2212_s30 = sshll.u32 %s2339_s18, 4  ;;  %s2213_s30 = int_to_ptr.vmem [resolvable:$false] %s2212_s30 }
 0x1f8   : > { %s2214_s16 = scalar_lea.vmem %s2213_s30, 2048  ;;  %p2215_p4 = scmp.lt.s32.totalorder %s2735_s0, %s2213_s30 }
 0x1f9   : > { %p2216_p7 = scmp.lt.s32.totalorder %s2214_s16, %s2208_s1 }
 0x1fb   : > { %p2217_p8 = por %p2216_p7, %p2215_p4 }
 0x1fd   : > { %p2218_p9 = pnand %p2217_p8, %p2211_p3 }
 0x1ff   : > { %2221 = shalt.err (!%p2218_p9)
}
 0x200   : > { %s2222_s3 = scalar_lea.hbm %s2733_s19, 1024  ;;  %s2226_s15 = scalar_lea.hbm %s2906_s10, 3072 }
 0x201   : > { %p2223_p10 = scmp.ne.s32.totalorder %s2733_s19, %s2222_s3  ;;  %p2227_p13 = scmp.lt.u32.totalorder %s2733_s19, %s2906_s10 }
 0x202   : > { %p2228_p0 = scmp.lt.u32.totalorder %s2226_s15, %s2222_s3  ;;  %p2230_p2 = scmp.lt.u32.totalorder %s2222_s3, %s2733_s19 }
 0x203   : > { %p2224_p11 = pnand %p2223_p10, %p2449_p5 }
 0x204   : > { %p2229_p1 = por %p2228_p0, %p2227_p13 }
 0x205   : > { %p2225_p12 = pneg %p2224_p11 }
 0x206   : > { %p2231_p3 = por %p2230_p2, %p2229_p1 }
 0x208   : > { %p2232_p4 = pnand %p2231_p3, %p2225_p12 }
 0x20a   : > { %2235 = shalt.err (!%p2232_p4)
}
 0x20b   : > { %s2340_s1 = smov 64   ;;  %s2341_s16 = smov 4   ;;  %v2068_v49 = vpop.f32.mrb[34].mxu0  ;;  %v2072_v50 = vpop.f32.mrb[18].mxu1 }
 0x20c   : > { %2098 = dma.vmem_to_hbm [thread:$0]  (%p2449_p5), %s2735_s0, 1024, %s2733_s19, %s2760_s4, %s2340_s1, %s2340_s1, %s2341_s16  }
 0x20d   : > { %s2236_s3 = scalar_lea.vmem %s2737_s26, 1024  ;;  %s2342_s25 = smov [#allocation6]  }
 0x20e   : > { %p2237_p7 = scmp.ne.s32.totalorder %s2737_s26, %s2236_s3  ;;  %s2240_s28 = sshll.u32 %s2342_s25, 4  ;;  %s2241_s28 = int_to_ptr.vmem [resolvable:$false] %s2240_s28 }
 0x20f   : > { %s2242_s15 = scalar_lea.vmem %s2241_s28, 2048  ;;  %p2243_p10 = scmp.lt.s32.totalorder %s2737_s26, %s2241_s28 }
 0x210   : > { %p2238_p8 = pnand %p2237_p7, %p2449_p5  ;;  %p2244_p11 = scmp.lt.s32.totalorder %s2242_s15, %s2236_s3 }
 0x212   : > { %p2239_p9 = pneg %p2238_p8  ;;  %p2245_p12 = por %p2244_p11, %p2243_p10 }
 0x214   : > { %p2246_p13 = pnand %p2245_p12, %p2239_p9 }
 0x216   : > { %2249 = shalt.err (!%p2246_p13)
}
 0x217   : > { %s2250_s0 = scalar_lea.hbm %s2745_s2, 1024  ;;  %s2254_s30 = scalar_lea.hbm %s2907_s11, 3072 }
 0x218   : > { %p2251_p0 = scmp.ne.s32.totalorder %s2745_s2, %s2250_s0  ;;  %p2255_p3 = scmp.lt.u32.totalorder %s2745_s2, %s2907_s11 }
 0x219   : > { %p2256_p4 = scmp.lt.u32.totalorder %s2254_s30, %s2250_s0  ;;  %p2258_p8 = scmp.lt.u32.totalorder %s2250_s0, %s2745_s2 }
 0x21a   : > { %p2252_p1 = pnand %p2251_p0, %p2449_p5 }
 0x21b   : > { %p2257_p7 = por %p2256_p4, %p2255_p3 }
 0x21c   : > { %p2253_p2 = pneg %p2252_p1 }
 0x21d   : > { %p2259_p9 = por %p2258_p8, %p2257_p7 }
 0x21f   : > { %p2260_p10 = pnand %p2259_p9, %p2253_p2 }
 0x221   : > { %2263 = shalt.err (!%p2260_p10)
}
 0x222   : > { %2099 = dma.vmem_to_hbm [thread:$0]  (%p2449_p5), %s2737_s26, 1024, %s2745_s2, %s2760_s4, %s2340_s1, %s2340_s1, %s2341_s16   ;;  %v1242_v51 = vadd.f32 %v2067_v27, %v2752_v29  ;;  %v1258_v52 = vadd.f32 %v2071_v46, %v2752_v29  ;;  %v1245_v53 = vadd.f32 %v2068_v49, %v2752_v29  ;;  %v1261_v54 = vadd.f32 %v2072_v50, %v2752_v29  ;;  %v1236_v55 = vpop.f32.mrb[35].mxu0  ;;  %v1252_v56 = vpop.f32.mrb[19].mxu1 }
 0x223   : > { %v1234_v57 = vadd.f32 %v2752_v29, %v2754_v47  ;;  %v1250_v58 = vadd.f32 %v2752_v29, %v2756_v48  ;;  %v1237_v59 = vadd.f32 %v2752_v29, %v1236_v55  ;;  %v1253_v60 = vadd.f32 %v2752_v29, %v1252_v56  ;;  %s2823_s2 = scalar_lea.vmem [#allocation7], %s2671_s17  ;;  %v2075_v1 = vpop.f32.mrb[20].mxu1  ;;  %s2844_s3 = scalar_lea.hbm %s2908_s12, %s2717_s20 }
 0x224   : > { %v1857_v61 = vpack.c.bf16 %v1245_v53, %v1242_v51  ;;  %v1867_v62 = vpack.c.bf16 %v1261_v54, %v1258_v52  ;;  %v1265_v2 = vpop.f32.mrb[21].mxu1  ;;  %v1274_v4 = vadd.f32 %v2075_v1, %v2752_v29  ;;  %s1453_s4 = sshll.u32 %s2823_s2, 4  ;;  %s1392_s15 = scalar_lea.sflag [#allocation8], %s2544_s29  ;;  %s2846_s4 = int_to_ptr.vmem [resolvable:$true] %s1453_s4 }
 0x225   : > { %v1852_v63 = vpack.c.bf16 %v1237_v59, %v1234_v57  ;;  %v1862_v0 = vpack.c.bf16 %v1253_v60, %v1250_v58  ;;  %v2076_v3 = vpop.f32.mrb[22].mxu1  ;;  %v1266_v7 = vadd.f32 %v2752_v29, %v1265_v2  ;;  %s2264_s0 = scalar_lea.vmem %s2846_s4, 1024  ;;  %s2343_s19 = smov [#allocation7]  }
 0x226   : > { %1903 = vst [vmem:[%s2823_s2 + $0x8] sm:$0xff] %v1857_v61   ;;  %1905 = vst [vmem:[%s2823_s2 + $0x18] sm:$0xff] %v1867_v62   ;;  %v1277_v5 = vadd.f32 %v2076_v3, %v2752_v29  ;;  %v1268_v6 = vpop.f32.mrb[23].mxu1  ;;  %p2265_p11 = scmp.ne.s32.totalorder %s2846_s4, %s2264_s0  ;;  %s2268_s18 = sshll.u32 %s2343_s19, 4  ;;  %s2269_s18 = int_to_ptr.vmem [resolvable:$false] %s2268_s18 }
 0x227   : > { %1853 = vst [vmem:[%s2823_s2] sm:$0xff] %v1852_v63   ;;  %1904 = vst [vmem:[%s2823_s2 + $0x10] sm:$0xff] %v1862_v0   ;;  %v1269_v8 = vadd.f32 %v2752_v29, %v1268_v6  ;;  %v2079_v11 = vpop.f32.mrb[24].mxu1  ;;  %s2270_s30 = scalar_lea.vmem %s2269_s18, 2048  ;;  %p2271_p0 = scmp.lt.s32.totalorder %s2846_s4, %s2269_s18 }
 0x228   : > { %v1877_v9 = vpack.c.bf16 %v1277_v5, %v1274_v4  ;;  %v1281_v12 = vpop.f32.mrb[25].mxu1  ;;  %v1290_v14 = vadd.f32 %v2079_v11, %v2752_v29  ;;  %p2266_p12 = pnand %p2265_p11, %p2449_p5  ;;  %p2272_p1 = scmp.lt.s32.totalorder %s2270_s30, %s2264_s0 }
 0x229   : > { %v1872_v10 = vpack.c.bf16 %v1269_v8, %v1266_v7  ;;  %v2080_v13 = vpop.f32.mrb[26].mxu1  ;;  %v1282_v17 = vadd.f32 %v2752_v29, %v1281_v12 }
 0x22a   : > { %1907 = vst [vmem:[%s2823_s2 + $0x28] sm:$0xff] %v1877_v9   ;;  %v1293_v15 = vadd.f32 %v2080_v13, %v2752_v29  ;;  %v1284_v16 = vpop.f32.mrb[27].mxu1  ;;  %p2267_p13 = pneg %p2266_p12  ;;  %p2273_p2 = por %p2272_p1, %p2271_p0 }
 0x22b   : > { %1906 = vst [vmem:[%s2823_s2 + $0x20] sm:$0xff] %v1872_v10   ;;  %v1285_v18 = vadd.f32 %v2752_v29, %v1284_v16 }
 0x22c   : > { %v1887_v19 = vpack.c.bf16 %v1293_v15, %v1290_v14  ;;  %p2274_p3 = pnand %p2273_p2, %p2267_p13 }
 0x22d   : > { %v1882_v20 = vpack.c.bf16 %v1285_v18, %v1282_v17 }
 0x22e   : > { %1909 = vst [vmem:[%s2823_s2 + $0x38] sm:$0xff] %v1887_v19  }
 0x22f   : > { %1908 = vst [vmem:[%s2823_s2 + $0x30] sm:$0xff] %v1882_v20  }
 0x230   : > { %2277 = shalt.err (!%p2274_p3)
}
 0x231   : > { %s2278_s20 = scalar_lea.hbm %s2844_s3, 1024  ;;  %s2282_s2 = scalar_lea.hbm %s2908_s12, 3072 }
 0x232   : > { %p2279_p4 = scmp.ne.s32.totalorder %s2844_s3, %s2278_s20  ;;  %p2283_p9 = scmp.lt.u32.totalorder %s2844_s3, %s2908_s12 }
 0x233   : > { %p2284_p10 = scmp.lt.u32.totalorder %s2282_s2, %s2278_s20  ;;  %p2286_p12 = scmp.lt.u32.totalorder %s2278_s20, %s2844_s3 }
 0x234   : > { %p2280_p7 = pnand %p2279_p4, %p2449_p5 }
 0x235   : > { %p2285_p11 = por %p2284_p10, %p2283_p9 }
 0x236   : > { %p2281_p8 = pneg %p2280_p7 }
 0x237   : > { %p2287_p13 = por %p2286_p12, %p2285_p11 }
 0x239   : > { %p2288_p0 = pnand %p2287_p13, %p2281_p8 }
 0x23b   : > { %2291 = shalt.err (!%p2288_p0)
}
 0x23c   : > { %2100 = dma.vmem_to_hbm [thread:$0]  (%p2449_p5), %s2846_s4, 1024, %s2844_s3, %s1392_s15, %s2340_s1, %s2340_s1, %s2341_s16  }
 0x23d PF: > { %p2118_p1 = scmp.ge.s32.totalorder %s2334_s24, 2  ;;  %s1468_s0 = sand.u32 1, %s2322_s21  }
 0x23e   : > { %s1469_s19 = scalar_lea.sflag [#allocation3], %s1468_s0 }
 0x23f   : > { %p2106_p2 = pnand %p2118_p1, %p2453_p6 }
 0x241   : > { %2309 = dma.done.wait (!%p2106_p2), %s1469_s19, 2048  }
 0x242   : > { %2311 = vsyncadd (!%p2106_p2), %s1469_s19, 4294965248  ;;  %s2924_s13 = sadd.s32 4294967294, %s2334_s24  }
 0x243   : > { %s1477_s18 = sand.u32 1, %s2924_s13  }
 0x244   : > { %s1478_s30 = scalar_lea.sflag [#allocation5], %s1477_s18 }
 0x245   : > { %2313 = dma.done.wait (!%p2106_p2), %s1478_s30, 2048  }
 0x246   : > { %2315 = vsyncadd (!%p2106_p2), %s1478_s30, 4294965248  ;;  %s1496_s29 = scalar_lea.sflag [#allocation8], %s1468_s0 }
 0x247   : > { %2317 = dma.done.wait (!%p2106_p2), %s1496_s29, 1024  }
 0x248   : > { %2319 = vsyncadd (!%p2106_p2), %s1496_s29, 4294966272  ;;  %s2925_s1 = sld [smem:[#allocation12_spill]]  ;;  %p29_p5 = scmp.ge.s32.totalorder %s2434_s27, 5  }
 0x249   : > { %s2926_s21 = smov %s2326_s22  ;;  %s2927_s22 = smov %s2330_s23 }
 0x24a   : > { %s2929_s24 = smov %s2434_s27  ;;  %31 = sbr.rel (!%p29_p5) target bundleno = 13 (0xd), region = 140 }
 0x24e   : > { %s2928_s23 = smov %s2925_s1 }
 0x251   :  { %1501 = vsyncpa [#allocation3], 1 }
 0x252   :  { %1503 = vsyncpa [#allocation3 + $0x1], 1 }
 0x253   :  { %1504 = vsyncpa [#allocation5], 1 }
 0x254   :  { %1506 = vsyncpa [#allocation5 + $0x1], 1 }
 0x255   :  { %1507 = vsyncpa [#allocation8], 1 }
 0x256   :  { %1509 = vsyncpa [#allocation8 + $0x1], 1 }

</bundles_post_ra>
